<compile_context>
chip_gen: v7x
topology: tpu7x:2x2x1
jax: 0.10.0
libtpu: 0.0.40
codegen_flags: <defaults>
</compile_context>

<pallas_src>
import jax
import jax.numpy as jnp
from jax.experimental import pallas as pl
from jax.experimental.pallas import tpu as pltpu

HIDDEN = 32   # hidden_size
VOCAB = 16    # output_size
MAXLEN = 8    # max_length (== number of encoder outputs)

# ---- packed weight-slab row layout (all blocks at lane offset 0) -------------
R_EA    = 0            # (V, L)   E @ attn_W^T[:H]      (embedding folded into attn)
R_EC    = 16           # (V, H)   E @ comb_W^T[:H]      (embedding folded into combine)
R_ABOT  = 32           # (H, L)   attn_W^T[H:]
R_CBOT  = 64           # (H, H)   comb_W^T[H:]
R_WIR   = 96           # (H, H)   W_ir^T
R_WIZ   = 128          # (H, H)   W_iz^T
R_WIN   = 160          # (H, H)   W_in^T
R_WHR   = 192          # (H, H)   W_hr^T
R_WHZ   = 224          # (H, H)   W_hz^T
R_WHN   = 256          # (H, H)   W_hn^T
R_OUT   = 288          # (H, V)   out_W^T
R_BATTN = 320          # (1, L)   attn bias
R_BCOMB = 321          # (1, H)   combine bias
R_BR    = 322          # (1, H)   b_ir + b_hr
R_BZ    = 323          # (1, H)   b_iz + b_hz
R_BIN   = 324          # (1, H)   b_in
R_BHN   = 325          # (1, H)   b_hn
R_BOUT  = 326          # (1, V)   out bias
SLAB_ROWS = 328        # padded to a multiple of 8 sublanes


def attention_decoder_kernel(tok_ref, w_ref, h_ref, enc_ref, out_ref):
    """tok_ref: SMEM (1,) int32 (scalar prefetch); w_ref: (SLAB_ROWS,128) packed params;
    h_ref: (1,H) previous hidden; enc_ref: (L,H) encoder outputs;
    out_ref: (8,128) lane-dense output slab (row0=logp, row1=h_new, row2=attn_w)."""
    f32 = jnp.float32
    H, V, L = HIDDEN, VOCAB, MAXLEN

    tok = tok_ref[0]
    h = h_ref[...]                                                   # (1, H)

    # single lane-dense output buffer; define every lane once.
    out_ref[...] = jnp.zeros((8, 128), f32)

    # one-hot(token): the embedding row-gather rides the MXU via the folded
    # E @ W blocks below (no XLA gather, no emb intermediate).
    onehot = (jax.lax.broadcasted_iota(jnp.int32, (1, V), 1) == tok).astype(f32)

    def mm(a, r0, rows, cols):
        return jnp.dot(a, w_ref[r0:r0 + rows, 0:cols],
                       preferred_element_type=f32)

    def bias(r0, cols):
        return w_ref[r0:r0 + 1, 0:cols]

    # attn logits = [emb | h] @ attn_W^T + b  ==  onehot @ (E@A_top) + h @ A_bot + b
    attn_logits = mm(onehot, R_EA, V, L) + mm(h, R_ABOT, H, L) + bias(R_BATTN, L)
    m = jnp.max(attn_logits, axis=1, keepdims=True)
    e = jnp.exp(attn_logits - m)
    # NOTE: approx=True would run fully on the EUP but costs ~1e-3 rel. error.
    attn_w = e * pl.reciprocal(jnp.sum(e, axis=1, keepdims=True), approx=False)

    # attn_applied = bmm(attn_weights, encoder_outputs)  -> (1, H)
    attn_applied = jnp.dot(attn_w, enc_ref[...], preferred_element_type=f32)

    # attn_combine([emb | attn_applied]) + ReLU  (emb side folded into EC)
    comb = (mm(onehot, R_EC, V, H) + mm(attn_applied, R_CBOT, H, H)
            + bias(R_BCOMB, H))
    x = jnp.maximum(comb, 0.0)

    # single-step GRU, PyTorch gate order (r, z, n); per-gate weight blocks so
    # every operand sits at lane offset 0 (no cross-lane shuffles).
    r = jax.nn.sigmoid(mm(x, R_WIR, H, H) + mm(h, R_WHR, H, H) + bias(R_BR, H))
    z = jax.nn.sigmoid(mm(x, R_WIZ, H, H) + mm(h, R_WHZ, H, H) + bias(R_BZ, H))
    n = jnp.tanh(mm(x, R_WIN, H, H) + bias(R_BIN, H)
                 + r * (mm(h, R_WHN, H, H) + bias(R_BHN, H)))
    h_new = (1.0 - z) * n + z * h

    # log_softmax(out(h_new), dim=1)
    out_logits = mm(h_new, R_OUT, H, V) + bias(R_BOUT, V)
    mo = jnp.max(out_logits, axis=1, keepdims=True)
    sh = out_logits - mo
    logp = sh - jnp.log(jnp.sum(jnp.exp(sh), axis=1, keepdims=True))

    # pack the three results into one lane-dense output slab (one output DMA).
    out_ref[0:1, 0:V] = logp
    out_ref[1:2, 0:H] = h_new
    out_ref[2:3, 0:L] = attn_w


def pack_params(params):
    """Pack all AttentionDecoder parameters into one (SLAB_ROWS, 128) f32 slab.
    Built once; reused across decode steps."""
    f32 = jnp.float32
    hp = jax.lax.Precision.HIGHEST
    H, V, L = HIDDEN, VOCAB, MAXLEN

    E = params["embedding"].astype(f32)                      # (V, H)
    A_t = params["attn_W"].T.astype(f32)                     # (2H, L)
    C_t = params["comb_W"].T.astype(f32)                     # (2H, H)
    wih = params["gru_w_ih"].astype(f32)                     # (3H, H)
    whh = params["gru_w_hh"].astype(f32)                     # (3H, H)
    bih = params["gru_b_ih"].astype(f32)
    bhh = params["gru_b_hh"].astype(f32)

    blocks = {
        R_EA:    jnp.dot(E, A_t[:H], precision=hp),          # (V, L)
        R_EC:    jnp.dot(E, C_t[:H], precision=hp),          # (V, H)
        R_ABOT:  A_t[H:],                                     # (H, L)
        R_CBOT:  C_t[H:],                                     # (H, H)
        R_WIR:   wih[0:H].T,
        R_WIZ:   wih[H:2 * H].T,
        R_WIN:   wih[2 * H:].T,
        R_WHR:   whh[0:H].T,
        R_WHZ:   whh[H:2 * H].T,
        R_WHN:   whh[2 * H:].T,
        R_OUT:   params["out_W"].T.astype(f32),               # (H, V)
        R_BATTN: params["attn_b"].astype(f32).reshape(1, L),
        R_BCOMB: params["comb_b"].astype(f32).reshape(1, H),
        R_BR:    (bih[0:H] + bhh[0:H]).reshape(1, H),
        R_BZ:    (bih[H:2 * H] + bhh[H:2 * H]).reshape(1, H),
        R_BIN:   bih[2 * H:].reshape(1, H),
        R_BHN:   bhh[2 * H:].reshape(1, H),
        R_BOUT:  params["out_b"].astype(f32).reshape(1, V),
    }
    slab = jnp.zeros((SLAB_ROWS, 128), f32)
    for r0, blk in blocks.items():
        slab = slab.at[r0:r0 + blk.shape[0], 0:blk.shape[1]].set(blk)
    return slab


@jax.jit
def attention_decoder_forward(token, hidden, encoder_outputs, wslab):
    """token: int32 scalar; hidden: (1,1,H); encoder_outputs: (L,H); wslab: packed params."""
    f32 = jnp.float32
    tok = jnp.reshape(jnp.asarray(token, jnp.int32), (1,))
    h0 = hidden.reshape(1, HIDDEN).astype(f32)
    enc = encoder_outputs.astype(f32)

    out = pl.pallas_call(
        attention_decoder_kernel,
        out_shape=jax.ShapeDtypeStruct((8, 128), f32),
        grid_spec=pltpu.PrefetchScalarGridSpec(
            num_scalar_prefetch=1,             # token id -> SMEM
            grid=(1,),
            in_specs=[
                pl.BlockSpec((SLAB_ROWS, 128), lambda i, tok_ref: (0, 0)),
                pl.BlockSpec((1, HIDDEN), lambda i, tok_ref: (0, 0)),
                pl.BlockSpec((MAXLEN, HIDDEN), lambda i, tok_ref: (0, 0)),
            ],
            out_specs=pl.BlockSpec((8, 128), lambda i, tok_ref: (0, 0)),
        ),
        compiler_params=pltpu.CompilerParams(
            # grid=(1,): nothing to shard.  Mark a real batch/beam axis
            # "parallel" here to use both TensorCores on v7x.
            dimension_semantics=("arbitrary",),
        ),
    )(tok, wslab, h0, enc)

    logp = out[0:1, 0:VOCAB]
    h_new = out[1:2, 0:HIDDEN].reshape(1, 1, HIDDEN)
    attn_w = out[2:3, 0:MAXLEN]
    return logp, h_new, attn_w


def reference_forward(token, hidden, encoder_outputs, params):
    """Pure-JAX reference matching the PyTorch forward (eval mode)."""
    H = HIDDEN
    emb = params["embedding"][token].reshape(1, H)
    h = hidden.reshape(1, H)
    cat1 = jnp.concatenate([emb, h], axis=1)
    attn_w = jax.nn.softmax(cat1 @ params["attn_W"].T + params["attn_b"], axis=1)
    attn_applied = attn_w @ encoder_outputs
    cat2 = jnp.concatenate([emb, attn_applied], axis=1)
    x = jax.nn.relu(cat2 @ params["comb_W"].T + params["comb_b"])
    gi = x @ params["gru_w_ih"].T + params["gru_b_ih"]
    gh = h @ params["gru_w_hh"].T + params["gru_b_hh"]
    r = jax.nn.sigmoid(gi[:, :H] + gh[:, :H])
    z = jax.nn.sigmoid(gi[:, H:2 * H] + gh[:, H:2 * H])
    n = jnp.tanh(gi[:, 2 * H:] + r * gh[:, 2 * H:])
    h_new = (1.0 - z) * n + z * h
    logits = h_new @ params["out_W"].T + params["out_b"]
    logp = jax.nn.log_softmax(logits, axis=1)
    return logp, h_new.reshape(1, 1, H), attn_w


def make_params(key):
    H, V, L = HIDDEN, VOCAB, MAXLEN
    ks = jax.random.split(key, 11)
    s = 0.1
    return {
        "embedding": jax.random.normal(ks[0], (V, H), jnp.float32) * s,
        "attn_W":    jax.random.normal(ks[1], (L, 2 * H), jnp.float32) * s,
        "attn_b":    jax.random.normal(ks[2], (L,), jnp.float32) * s,
        "comb_W":    jax.random.normal(ks[3], (H, 2 * H), jnp.float32) * s,
        "comb_b":    jax.random.normal(ks[4], (H,), jnp.float32) * s,
        "gru_w_ih":  jax.random.normal(ks[5], (3 * H, H), jnp.float32) * s,
        "gru_w_hh":  jax.random.normal(ks[6], (3 * H, H), jnp.float32) * s,
        "gru_b_ih":  jax.random.normal(ks[7], (3 * H,), jnp.float32) * s,
        "gru_b_hh":  jax.random.normal(ks[8], (3 * H,), jnp.float32) * s,
        "out_W":     jax.random.normal(ks[9], (V, H), jnp.float32) * s,
        "out_b":     jax.random.normal(ks[10], (V,), jnp.float32) * s,
    }


if __name__ == "__main__":
    key = jax.random.PRNGKey(0)
    pkey, hkey, ekey = jax.random.split(key, 3)
    params = make_params(pkey)
    wslab = pack_params(params)                       # one-time packing

    token = jnp.int32(3)                              # decoder input token id
    hidden = jax.random.normal(hkey, (1, 1, HIDDEN), jnp.float32) * 0.1
    encoder_outputs = jax.random.normal(ekey, (MAXLEN, HIDDEN), jnp.float32) * 0.1

    logp, h_new, attn_w = attention_decoder_forward(token, hidden, encoder_outputs, wslab)
    jax.block_until_ready((logp, h_new, attn_w))

    logp_r, h_new_r, attn_w_r = reference_forward(token, hidden, encoder_outputs, params)

    assert logp.shape == (1, VOCAB) and h_new.shape == (1, 1, HIDDEN) and attn_w.shape == (1, MAXLEN)
    assert jnp.allclose(logp, logp_r, rtol=1e-4, atol=1e-5)
    assert jnp.allclose(h_new, h_new_r, rtol=1e-4, atol=1e-5)
    assert jnp.allclose(attn_w, attn_w_r, rtol=1e-4, atol=1e-5)

    print("KERNEL_OK")
</pallas_src>

<mosaic_0001>
module attributes {stable_mosaic.version = 11 : i64} {
  func.func @attention_decoder_kernel(%arg0: i32, %arg1: memref<1xi32, #tpu.memory_space<smem>>, %arg2: memref<328x128xf32, #tpu.memory_space<vmem>>, %arg3: memref<1x32xf32, #tpu.memory_space<vmem>>, %arg4: memref<8x32xf32, #tpu.memory_space<vmem>>, %arg5: memref<8x128xf32, #tpu.memory_space<vmem>>) attributes {dimension_semantics = [#tpu.dimension_semantics<arbitrary>], iteration_bounds = array<i64: 1>, scalar_prefetch = 1 : i64, scratch_operands = 0 : i64, tpu.core_type = #tpu.core_type<tc>, window_params = [{pipeline_mode = #tpu.pipeline_mode<synchronous>, transform_indices = @transform_0, window_bounds = array<i64: 328, 128>}, {pipeline_mode = #tpu.pipeline_mode<synchronous>, transform_indices = @transform_1, window_bounds = array<i64: 1, 32>}, {pipeline_mode = #tpu.pipeline_mode<synchronous>, transform_indices = @transform_2, window_bounds = array<i64: 8, 32>}, {pipeline_mode = #tpu.pipeline_mode<synchronous>, transform_indices = @transform_3, window_bounds = array<i64: 8, 128>}]} {
    %c0 = arith.constant 0 : index
    %0 = memref.load %arg1[%c0] : memref<1xi32, #tpu.memory_space<smem>>
    %c0_0 = arith.constant 0 : index
    %c0_1 = arith.constant 0 : index
    %1 = vector.load %arg3[%c0_0, %c0_1] : memref<1x32xf32, #tpu.memory_space<vmem>>, vector<1x32xf32>
    %cst = arith.constant 0.000000e+00 : f32
    %2 = vector.broadcast %cst : f32 to vector<8x128xf32>
    %c0_2 = arith.constant 0 : index
    %c0_3 = arith.constant 0 : index
    %3 = vector.load %arg5[%c0_2, %c0_3] : memref<8x128xf32, #tpu.memory_space<vmem>>, vector<8x128xf32>
    tpu.vector_store %arg5[%c0_2, %c0_3], %2 {strides = array<i32>} : memref<8x128xf32, #tpu.memory_space<vmem>>, vector<8x128xf32>,
    %4 = tpu.iota {dimensions = array<i32: 1>} : vector<1x16xi32>
    %5 = vector.broadcast %0 : i32 to vector<1x16xi32>
    %6 = arith.cmpi eq, %4, %5 : vector<1x16xi32>
    %7 = arith.extui %6 : vector<1x16xi1> to vector<1x16xi32>
    %8 = arith.sitofp %7 : vector<1x16xi32> to vector<1x16xf32>
    %c0_4 = arith.constant 0 : index
    %c0_5 = arith.constant 0 : index
    %9 = vector.load %arg2[%c0_4, %c0_5] : memref<328x128xf32, #tpu.memory_space<vmem>>, vector<16x8xf32>
    %cst_6 = arith.constant dense<0.000000e+00> : vector<1x8xf32>
    %10 = tpu.matmul %8, %9, %cst_6 {dimension_numbers = #tpu.dot_dimension_numbers<[1], [0], [0], [1], [0, 0, 1, 1], [], []>} : vector<1x16xf32>, vector<16x8xf32>, vector<1x8xf32> -> vector<1x8xf32>
    %c32 = arith.constant 32 : index
    %c0_7 = arith.constant 0 : index
    %11 = vector.load %arg2[%c32, %c0_7] : memref<328x128xf32, #tpu.memory_space<vmem>>, vector<32x8xf32>
    %cst_8 = arith.constant dense<0.000000e+00> : vector<1x8xf32>
    %12 = tpu.matmul %1, %11, %cst_8 {dimension_numbers = #tpu.dot_dimension_numbers<[1], [0], [0], [1], [0, 0, 1, 1], [], []>} : vector<1x32xf32>, vector<32x8xf32>, vector<1x8xf32> -> vector<1x8xf32>
    %13 = arith.addf %10, %12 : vector<1x8xf32>
    %c320 = arith.constant 320 : index
    %c0_9 = arith.constant 0 : index
    %14 = vector.load %arg2[%c320, %c0_9] : memref<328x128xf32, #tpu.memory_space<vmem>>, vector<1x8xf32>
    %15 = arith.addf %13, %14 : vector<1x8xf32>
    %cst_10 = arith.constant dense<0xFF800000> : vector<1xf32>
    %16 = vector.multi_reduction <maximumf>, %15, %cst_10 [1] : vector<1x8xf32> to vector<1xf32>
    %17 = vector.shape_cast %16 : vector<1xf32> to vector<1x1xf32>
    %18 = vector.broadcast %17 : vector<1x1xf32> to vector<1x8xf32>
    %19 = arith.subf %15, %18 : vector<1x8xf32>
    %20 = math.exp %19 : vector<1x8xf32>
    %cst_11 = arith.constant dense<0.000000e+00> : vector<1xf32>
    %21 = vector.multi_reduction <add>, %20, %cst_11 [1] : vector<1x8xf32> to vector<1xf32>
    %22 = vector.shape_cast %21 : vector<1xf32> to vector<1x1xf32>
    %23 = tpu.reciprocal %22 : vector<1x1xf32> -> vector<1x1xf32>
    %24 = vector.broadcast %23 : vector<1x1xf32> to vector<1x8xf32>
    %25 = arith.mulf %20, %24 : vector<1x8xf32>
    %c0_12 = arith.constant 0 : index
    %c0_13 = arith.constant 0 : index
    %26 = vector.load %arg4[%c0_12, %c0_13] : memref<8x32xf32, #tpu.memory_space<vmem>>, vector<8x32xf32>
    %cst_14 = arith.constant dense<0.000000e+00> : vector<1x32xf32>
    %27 = tpu.matmul %25, %26, %cst_14 {dimension_numbers = #tpu.dot_dimension_numbers<[1], [0], [0], [1], [0, 0, 1, 1], [], []>} : vector<1x8xf32>, vector<8x32xf32>, vector<1x32xf32> -> vector<1x32xf32>
    %c16 = arith.constant 16 : index
    %c0_15 = arith.constant 0 : index
    %28 = vector.load %arg2[%c16, %c0_15] : memref<328x128xf32, #tpu.memory_space<vmem>>, vector<16x32xf32>
    %cst_16 = arith.constant dense<0.000000e+00> : vector<1x32xf32>
    %29 = tpu.matmul %8, %28, %cst_16 {dimension_numbers = #tpu.dot_dimension_numbers<[1], [0], [0], [1], [0, 0, 1, 1], [], []>} : vector<1x16xf32>, vector<16x32xf32>, vector<1x32xf32> -> vector<1x32xf32>
    %c64 = arith.constant 64 : index
    %c0_17 = arith.constant 0 : index
    %30 = vector.load %arg2[%c64, %c0_17] : memref<328x128xf32, #tpu.memory_space<vmem>>, vector<32x32xf32>
    %cst_18 = arith.constant dense<0.000000e+00> : vector<1x32xf32>
    %31 = tpu.matmul %27, %30, %cst_18 {dimension_numbers = #tpu.dot_dimension_numbers<[1], [0], [0], [1], [0, 0, 1, 1], [], []>} : vector<1x32xf32>, vector<32x32xf32>, vector<1x32xf32> -> vector<1x32xf32>
    %32 = arith.addf %29, %31 : vector<1x32xf32>
    %c321 = arith.constant 321 : index
    %c0_19 = arith.constant 0 : index
    %33 = vector.load %arg2[%c321, %c0_19] : memref<328x128xf32, #tpu.memory_space<vmem>>, vector<1x32xf32>
    %34 = arith.addf %32, %33 : vector<1x32xf32>
    %cst_20 = arith.constant 0.000000e+00 : f32
    %35 = vector.broadcast %cst_20 : f32 to vector<1x32xf32>
    %36 = arith.maximumf %34, %35 : vector<1x32xf32>
    %c96 = arith.constant 96 : index
    %c0_21 = arith.constant 0 : index
    %37 = vector.load %arg2[%c96, %c0_21] : memref<328x128xf32, #tpu.memory_space<vmem>>, vector<32x32xf32>
    %cst_22 = arith.constant dense<0.000000e+00> : vector<1x32xf32>
    %38 = tpu.matmul %36, %37, %cst_22 {dimension_numbers = #tpu.dot_dimension_numbers<[1], [0], [0], [1], [0, 0, 1, 1], [], []>} : vector<1x32xf32>, vector<32x32xf32>, vector<1x32xf32> -> vector<1x32xf32>
    %c192 = arith.constant 192 : index
    %c0_23 = arith.constant 0 : index
    %39 = vector.load %arg2[%c192, %c0_23] : memref<328x128xf32, #tpu.memory_space<vmem>>, vector<32x32xf32>
    %cst_24 = arith.constant dense<0.000000e+00> : vector<1x32xf32>
    %40 = tpu.matmul %1, %39, %cst_24 {dimension_numbers = #tpu.dot_dimension_numbers<[1], [0], [0], [1], [0, 0, 1, 1], [], []>} : vector<1x32xf32>, vector<32x32xf32>, vector<1x32xf32> -> vector<1x32xf32>
    %41 = arith.addf %38, %40 : vector<1x32xf32>
    %c322 = arith.constant 322 : index
    %c0_25 = arith.constant 0 : index
    %42 = vector.load %arg2[%c322, %c0_25] : memref<328x128xf32, #tpu.memory_space<vmem>>, vector<1x32xf32>
    %43 = arith.addf %41, %42 : vector<1x32xf32>
    %44 = arith.negf %43 : vector<1x32xf32>
    %45 = math.exp %44 : vector<1x32xf32>
    %cst_26 = arith.constant 1.000000e+00 : f32
    %46 = vector.broadcast %cst_26 : f32 to vector<1x32xf32>
    %47 = arith.addf %46, %45 : vector<1x32xf32>
    %48 = arith.divf %46, %47 : vector<1x32xf32>
    %c128 = arith.constant 128 : index
    %c0_27 = arith.constant 0 : index
    %49 = vector.load %arg2[%c128, %c0_27] : memref<328x128xf32, #tpu.memory_space<vmem>>, vector<32x32xf32>
    %cst_28 = arith.constant dense<0.000000e+00> : vector<1x32xf32>
    %50 = tpu.matmul %36, %49, %cst_28 {dimension_numbers = #tpu.dot_dimension_numbers<[1], [0], [0], [1], [0, 0, 1, 1], [], []>} : vector<1x32xf32>, vector<32x32xf32>, vector<1x32xf32> -> vector<1x32xf32>
    %c224 = arith.constant 224 : index
    %c0_29 = arith.constant 0 : index
    %51 = vector.load %arg2[%c224, %c0_29] : memref<328x128xf32, #tpu.memory_space<vmem>>, vector<32x32xf32>
    %cst_30 = arith.constant dense<0.000000e+00> : vector<1x32xf32>
    %52 = tpu.matmul %1, %51, %cst_30 {dimension_numbers = #tpu.dot_dimension_numbers<[1], [0], [0], [1], [0, 0, 1, 1], [], []>} : vector<1x32xf32>, vector<32x32xf32>, vector<1x32xf32> -> vector<1x32xf32>
    %53 = arith.addf %50, %52 : vector<1x32xf32>
    %c323 = arith.constant 323 : index
    %c0_31 = arith.constant 0 : index
    %54 = vector.load %arg2[%c323, %c0_31] : memref<328x128xf32, #tpu.memory_space<vmem>>, vector<1x32xf32>
    %55 = arith.addf %53, %54 : vector<1x32xf32>
    %56 = arith.negf %55 : vector<1x32xf32>
    %57 = math.exp %56 : vector<1x32xf32>
    %cst_32 = arith.constant 1.000000e+00 : f32
    %58 = vector.broadcast %cst_32 : f32 to vector<1x32xf32>
    %59 = arith.addf %58, %57 : vector<1x32xf32>
    %60 = arith.divf %58, %59 : vector<1x32xf32>
    %c160 = arith.constant 160 : index
    %c0_33 = arith.constant 0 : index
    %61 = vector.load %arg2[%c160, %c0_33] : memref<328x128xf32, #tpu.memory_space<vmem>>, vector<32x32xf32>
    %cst_34 = arith.constant dense<0.000000e+00> : vector<1x32xf32>
    %62 = tpu.matmul %36, %61, %cst_34 {dimension_numbers = #tpu.dot_dimension_numbers<[1], [0], [0], [1], [0, 0, 1, 1], [], []>} : vector<1x32xf32>, vector<32x32xf32>, vector<1x32xf32> -> vector<1x32xf32>
    %c324 = arith.constant 324 : index
    %c0_35 = arith.constant 0 : index
    %63 = vector.load %arg2[%c324, %c0_35] : memref<328x128xf32, #tpu.memory_space<vmem>>, vector<1x32xf32>
    %64 = arith.addf %62, %63 : vector<1x32xf32>
    %c256 = arith.constant 256 : index
    %c0_36 = arith.constant 0 : index
    %65 = vector.load %arg2[%c256, %c0_36] : memref<328x128xf32, #tpu.memory_space<vmem>>, vector<32x32xf32>
    %cst_37 = arith.constant dense<0.000000e+00> : vector<1x32xf32>
    %66 = tpu.matmul %1, %65, %cst_37 {dimension_numbers = #tpu.dot_dimension_numbers<[1], [0], [0], [1], [0, 0, 1, 1], [], []>} : vector<1x32xf32>, vector<32x32xf32>, vector<1x32xf32> -> vector<1x32xf32>
    %c325 = arith.constant 325 : index
    %c0_38 = arith.constant 0 : index
    %67 = vector.load %arg2[%c325, %c0_38] : memref<328x128xf32, #tpu.memory_space<vmem>>, vector<1x32xf32>
    %68 = arith.addf %66, %67 : vector<1x32xf32>
    %69 = arith.mulf %48, %68 : vector<1x32xf32>
    %70 = arith.addf %64, %69 : vector<1x32xf32>
    %71 = math.tanh %70 : vector<1x32xf32>
    %cst_39 = arith.constant 1.000000e+00 : f32
    %72 = vector.broadcast %cst_39 : f32 to vector<1x32xf32>
    %73 = arith.subf %72, %60 : vector<1x32xf32>
    %74 = arith.mulf %73, %71 : vector<1x32xf32>
    %75 = arith.mulf %60, %1 : vector<1x32xf32>
    %76 = arith.addf %74, %75 : vector<1x32xf32>
    %c288 = arith.constant 288 : index
    %c0_40 = arith.constant 0 : index
    %77 = vector.load %arg2[%c288, %c0_40] : memref<328x128xf32, #tpu.memory_space<vmem>>, vector<32x16xf32>
    %cst_41 = arith.constant dense<0.000000e+00> : vector<1x16xf32>
    %78 = tpu.matmul %76, %77, %cst_41 {dimension_numbers = #tpu.dot_dimension_numbers<[1], [0], [0], [1], [0, 0, 1, 1], [], []>} : vector<1x32xf32>, vector<32x16xf32>, vector<1x16xf32> -> vector<1x16xf32>
    %c326 = arith.constant 326 : index
    %c0_42 = arith.constant 0 : index
    %79 = vector.load %arg2[%c326, %c0_42] : memref<328x128xf32, #tpu.memory_space<vmem>>, vector<1x16xf32>
    %80 = arith.addf %78, %79 : vector<1x16xf32>
    %cst_43 = arith.constant dense<0xFF800000> : vector<1xf32>
    %81 = vector.multi_reduction <maximumf>, %80, %cst_43 [1] : vector<1x16xf32> to vector<1xf32>
    %82 = vector.shape_cast %81 : vector<1xf32> to vector<1x1xf32>
    %83 = vector.broadcast %82 : vector<1x1xf32> to vector<1x16xf32>
    %84 = arith.subf %80, %83 : vector<1x16xf32>
    %85 = math.exp %84 : vector<1x16xf32>
    %cst_44 = arith.constant dense<0.000000e+00> : vector<1xf32>
    %86 = vector.multi_reduction <add>, %85, %cst_44 [1] : vector<1x16xf32> to vector<1xf32>
    %87 = vector.shape_cast %86 : vector<1xf32> to vector<1x1xf32>
    %88 = math.log %87 : vector<1x1xf32>
    %89 = vector.broadcast %88 : vector<1x1xf32> to vector<1x16xf32>
    %90 = arith.subf %84, %89 : vector<1x16xf32>
    %c0_45 = arith.constant 0 : index
    %c0_46 = arith.constant 0 : index
    %91 = vector.load %arg5[%c0_45, %c0_46] : memref<8x128xf32, #tpu.memory_space<vmem>>, vector<1x16xf32>
    tpu.vector_store %arg5[%c0_45, %c0_46], %90 {strides = array<i32>} : memref<8x128xf32, #tpu.memory_space<vmem>>, vector<1x16xf32>,
    %c1 = arith.constant 1 : index
    %c0_47 = arith.constant 0 : index
    %92 = vector.load %arg5[%c1, %c0_47] : memref<8x128xf32, #tpu.memory_space<vmem>>, vector<1x32xf32>
    tpu.vector_store %arg5[%c1, %c0_47], %76 {strides = array<i32>} : memref<8x128xf32, #tpu.memory_space<vmem>>, vector<1x32xf32>,
    %c2 = arith.constant 2 : index
    %c0_48 = arith.constant 0 : index
    %93 = vector.load %arg5[%c2, %c0_48] : memref<8x128xf32, #tpu.memory_space<vmem>>, vector<1x8xf32>
    tpu.vector_store %arg5[%c2, %c0_48], %25 {strides = array<i32>} : memref<8x128xf32, #tpu.memory_space<vmem>>, vector<1x8xf32>,
    return
  }
  func.func @transform_0(%arg0: i32, %arg1: memref<1xi32, #tpu.memory_space<smem>>) -> (i32, i32) {
    %c0_i32 = arith.constant 0 : i32
    %c0_i32_0 = arith.constant 0 : i32
    %c0_i32_1 = arith.constant 0 : i32
    return %c0_i32, %c0_i32_0 : i32, i32
  }
  func.func @transform_1(%arg0: i32, %arg1: memref<1xi32, #tpu.memory_space<smem>>) -> (i32, i32) {
    %c0_i32 = arith.constant 0 : i32
    %c0_i32_0 = arith.constant 0 : i32
    %c0_i32_1 = arith.constant 0 : i32
    return %c0_i32, %c0_i32_0 : i32, i32
  }
  func.func @transform_2(%arg0: i32, %arg1: memref<1xi32, #tpu.memory_space<smem>>) -> (i32, i32) {
    %c0_i32 = arith.constant 0 : i32
    %c0_i32_0 = arith.constant 0 : i32
    %c0_i32_1 = arith.constant 0 : i32
    return %c0_i32, %c0_i32_0 : i32, i32
  }
  func.func @transform_3(%arg0: i32, %arg1: memref<1xi32, #tpu.memory_space<smem>>) -> (i32, i32) {
    %c0_i32 = arith.constant 0 : i32
    %c0_i32_0 = arith.constant 0 : i32
    %c0_i32_1 = arith.constant 0 : i32
    return %c0_i32, %c0_i32_0 : i32, i32
  }
}

</mosaic_0001>

<bundles_post_ra>
// kernel: attention_decoder_forward.1
= control target key start
LH: loop header
LB: loop body
LE: loop exit
PB: predicated region body
PF: predicated region fallthrough
CT: control target
= control target key end

     0   :  { %10 = vsyncpa [#allocation5], 0  ;;  %s1300_s15 = smov [#allocation4]   ;;  %s1435_s0 = inlined_call_operand.<no memory space> [shape: s32[1], index: 0, kind: input, shape index: {}]   ;;  %s1436_s1 = inlined_call_operand.hbm [shape: f32[328,128], index: 1, kind: input, shape index: {}]   ;;  %s1437_s2 = inlined_call_operand.vmem [shape: f32[1,32], index: 2, kind: input, shape index: {}]   ;;  %s1438_s3 = inlined_call_operand.vmem [shape: f32[8,32], index: 3, kind: input, shape index: {}]   ;;  %s1439_s4 = inlined_call_operand.vmem [shape: f32[8,128], index: 4, kind: output, shape index: {}]  }
   0x1   :  { %s16_s16 = sshll.u32 %s1300_s15, 4  ;;  %s1276_s19 = scalar_lea.hbm %s1436_s1, 5248  ;;  %s17_s16 = int_to_ptr.vmem [resolvable:$true] %s16_s16 }
   0x2   :  { %p1277_p0 = scmp.ne.s32.totalorder %s1436_s1, %s1276_s19  ;;  %p1280_p1 = scmp.lt.u32.totalorder %s1276_s19, %s1436_s1 }
   0x4   :  { %p1282_p2 = pnand %p1280_p1, %p1277_p0 }
   0x6   :  { %1285 = shalt.err (!%p1282_p2)
}
   0x7   :  { %s1286_s24 = scalar_lea.vmem %s17_s16, 5248  ;;  %p1291_p4 = scmp.lt.s32.totalorder %s17_s16, %s17_s16 }
   0x8   :  { %p1287_p3 = scmp.ne.s32.totalorder %s17_s16, %s1286_s24  ;;  %p1292_p5 = scmp.lt.s32.totalorder %s1286_s24, %s1286_s24 }
   0xa   :  { %p1293_p6 = por %p1292_p5, %p1291_p4 }
   0xc   :  { %p1294_p7 = pnand %p1293_p6, %p1287_p3 }
   0xe   :  { %1297 = shalt.err (!%p1294_p7)
}
   0xf   :  { %s1301_s25 = smov 128   ;;  %s1302_s26 = smov 8  }
  0x10   :  { %22 = dma.hbm_to_vmem [thread:$0]  %s1436_s1, 5248, %s17_s16, [#allocation5], %s1301_s25, %s1301_s25, %s1302_s26  }
  0x11   :  { %1298 = dma.done.wait [#allocation5], 5248  }
  0x12   :  { %1299 = vsyncadd [#allocation5], 4294962048  ;;  %v33_v0 = vlaneseq  ;;  %v1303_v1 = vmov 0.0|0.0   ;;  %v1304_v2 = vmov 0.0   ;;  %vm1305_vm0 = vmmov 0   ;;  %v41_v5 = vld [vmem:[#allocation4 + $0x20] sm:$0xff] }
  0x13   :  { %1192 = vmatprep.subr.bf16.mxu0 %v1303_v1  ;;  %1198 = vmatprep.subr.bf16.mxu1 %v1303_v1  ;;  %32 = vst [vmem:[%s1439_s4] sm:$0xff] %v1304_v2  ;;  %v35_v4 = vstv %s1435_s0  ;;  %v42_v6 = vld [vmem:[#allocation4 + $0x28] sm:$0xff]  ;;  %v39_v7 = vld [vmem:[#allocation4] sm:$0xff]  ;;  %v43_v10 = vld [vmem:[#allocation4 + $0x30] sm:$0xff]  ;;  %vm119_vm2 = vcmask 130048   ;;  %vm45_vm3 = vcmask 261120   ;;  %vm195_vm4 = vcmask 57344  }
  0x14   :  { %1089 = vmatprep.mubr.msk.f32.mxu1 %vm1305_vm0, %v1304_v2  ;;  %1082 = vmatprep.mubr.msk.f32.mxu0 %vm1305_vm0, %v1304_v2  ;;  %v34_v3 = vand.u32 127, %v33_v0  ;;  %v1193_v8 = vpack.c.bf16 %v42_v6, %v41_v5  ;;  %v40_v9 = vld [vmem:[#allocation4 + $0x8] sm:$0xff]  ;;  %v44_v11 = vld [vmem:[#allocation4 + $0x38] sm:$0xff]  ;;  %v1363_v15 = vld [vmem:[%s1437_s2] sm:$0x1]  ;;  %vm208_vm5 = vcmask 64512  }
  0x15   :  { %v1199_v12 = vpack.c.bf16 %v40_v9, %v39_v7  ;;  %v1196_v13 = vpack.c.bf16 %v44_v11, %v43_v10  ;;  %v193_v19 = vld [vmem:[#allocation4 + $0x140] sm:$0x1]  ;;  %v285_v31 = vld [vmem:[#allocation4 + $0x48] sm:$0xff]  ;;  %v286_v33 = vld [vmem:[#allocation4 + $0x50] sm:$0xff]  ;;  %vm998_vm6 = vcmask 253952   ;;  %vm984_vm7 = vcmask 122880  }
  0x16   :  { %vm36_vm1 = vcmp.eq.s32.totalorder %v34_v3, %v35_v4  ;;  %1194 = vmatpush3.bf16.msra.mxu0 %v1193_v8  ;;  %v207_v29 = vld [vmem:[%s1438_s3] sm:$0xff]  ;;  %v287_v34 = vld [vmem:[#allocation4 + $0x58] sm:$0xff]  ;;  %v282_v37 = vld [vmem:[#allocation4 + $0x10] sm:$0xff] }
  0x17   :  { %1195 = vmatprep.subr.bf16.mxu0 %v1303_v1  ;;  %1200 = vmatpush3.bf16.msra.mxu1 %v1199_v12  ;;  %v1006_v14 = vsel %vm36_vm1, 1.0, %v1304_v2  ;;  %v284_v30 = vld [vmem:[#allocation4 + $0x40] sm:$0xff]  ;;  %v1205_v35 = vpack.c.bf16 %v287_v34, %v286_v33  ;;  %v283_v38 = vld [vmem:[#allocation4 + $0x18] sm:$0xff]  ;;  %v439_v43 = vld [vmem:[#allocation4 + $0xc8] sm:$0xff] }
  0x18   :  { %1092 = vmatprep.subr.mxu1 %v1304_v2  ;;  %v1202_v32 = vpack.c.bf16 %v285_v31, %v284_v30  ;;  %v1208_v40 = vpack.c.bf16 %v283_v38, %v282_v37  ;;  %v438_v42 = vld [vmem:[#allocation4 + $0xc0] sm:$0xff]  ;;  %v440_v44 = vld [vmem:[#allocation4 + $0xd0] sm:$0xff]  ;;  %v441_v46 = vld [vmem:[#allocation4 + $0xd8] sm:$0xff] }
  0x19   :  { %v1211_v45 = vpack.c.bf16 %v439_v43, %v438_v42  ;;  %v1214_v47 = vpack.c.bf16 %v441_v46, %v440_v44  ;;  %v597_v48 = vld [vmem:[#allocation4 + $0xe0] sm:$0xff]  ;;  %v598_v49 = vld [vmem:[#allocation4 + $0xe8] sm:$0xff]  ;;  %v599_v51 = vld [vmem:[#allocation4 + $0xf0] sm:$0xff] }
  0x1a   :  { %1197 = vmatpush3.bf16.msra.mxu0 %v1196_v13  ;;  %1090 = vmatmul.mubr.msk.f32.vlgmr.msra.gmra.mrb[0].mxu1 %vm119_vm2, %v1006_v14  ;;  %v1223_v50 = vpack.c.bf16 %v598_v49, %v597_v48  ;;  %v600_v52 = vld [vmem:[#allocation4 + $0xf8] sm:$0xff]  ;;  %v434_v54 = vld [vmem:[#allocation4 + $0x60] sm:$0xff]  ;;  %v435_v55 = vld [vmem:[#allocation4 + $0x68] sm:$0xff] }
  0x1b   :  { %1094 = vmatprep.mubr.msk.f32.mxu1 %vm1305_vm0, %v1304_v2  ;;  %1201 = vmatprep.subr.bf16.mxu0 %v1303_v1  ;;  %v1226_v53 = vpack.c.bf16 %v600_v52, %v599_v51  ;;  %v1217_v56 = vpack.c.bf16 %v435_v55, %v434_v54  ;;  %v749_v61 = vld [vmem:[#allocation4 + $0xa0] sm:$0xff]  ;;  %v750_v62 = vld [vmem:[#allocation4 + $0xa8] sm:$0xff]  ;;  %v436_v0 = vld [vmem:[#allocation4 + $0x70] sm:$0xff] }
  0x1c   :  { %1093 = vmatpush3.msra.mxu1 %v207_v29  ;;  %v1235_v63 = vpack.c.bf16 %v750_v62, %v749_v61  ;;  %v437_v3 = vld [vmem:[#allocation4 + $0x78] sm:$0xff]  ;;  %v751_v5 = vld [vmem:[#allocation4 + $0xb0] sm:$0xff]  ;;  %v431_v13 = vld [vmem:[#allocation4 + $0x141] sm:$0x1] }
  0x1d   :  { %1083 = vmatmul.mubr.msk.f32.vlgmr.msra.gmra.mrb[0].mxu0 %vm45_vm3, %v1363_v15  ;;  %1207 = vmatprep.subr.bf16.mxu1 %v1303_v1  ;;  %v1220_v4 = vpack.c.bf16 %v437_v3, %v436_v0  ;;  %v752_v6 = vld [vmem:[#allocation4 + $0xb8] sm:$0xff]  ;;  %v906_v31 = vld [vmem:[#allocation4 + $0x120] sm:$0xff]  ;;  %v908_v33 = vld [vmem:[#allocation4 + $0x130] sm:$0xff] }
  0x1e   :  { %1105 = vmatprep.mubr.msk.f32.mxu0 %vm1305_vm0, %v1304_v2  ;;  %1203 = vmatpush3.bf16.msra.mxu0 %v1202_v32  ;;  %v1238_v7 = vpack.c.bf16 %v752_v6, %v751_v5  ;;  %v827_v29 = vld [vmem:[#allocation4 + $0x118] sm:$0xff]  ;;  %v907_v32 = vld [vmem:[#allocation4 + $0x128] sm:$0xff]  ;;  %v585_v38 = vld [vmem:[#allocation4 + $0x142] sm:$0x1] }
  0x1f   :  { %1204 = vmatprep.subr.bf16.mxu0 %v1303_v1  ;;  %v1247_v34 = vpack.c.bf16 %v907_v32, %v906_v31  ;;  %v910_v6 = vld [vmem:[#allocation4 + $0x146] sm:$0x1] }
  0x22   :  { %1206 = vmatpush3.bf16.msra.mxu0 %v1205_v35  ;;  %v909_v35 = vld [vmem:[#allocation4 + $0x138] sm:$0xff] }
  0x23   :  { %1216 = vmatprep.subr.bf16.mxu0 %v1303_v1 }
  0xed   :  { %v189_v16 = vpop.f32.mrb[0].mxu1 }
  0xee   :  { %v1091_v17 = vpop.f32.mrb[1].mxu1 }
  0xef   :  { %v593_v17 = vld [vmem:[#allocation4 + $0x80] sm:$0xff] }
  0xf0   :  { %v115_v18 = vpop.f32.mrb[0].mxu0 }
  0xf1   :  { %v190_v20 = vadd.f32 %v189_v16, %v115_v18  ;;  %v1084_v21 = vpop.f32.mrb[1].mxu0  ;;  %v594_v18 = vld [vmem:[#allocation4 + $0x88] sm:$0xff] }
  0xf3   :  { %v194_v22 = vadd.f32 %v193_v19, %v190_v20  ;;  %v1229_v20 = vpack.c.bf16 %v594_v18, %v593_v17 }
  0xf5   :  { %v196_v23 = vsel %vm195_vm4, %v194_v22, -inf }
  0xf6   :  { %197 = vmax.xlane.f32.xlu0 %v196_v23  ;;  %v596_v23 = vld [vmem:[#allocation4 + $0x98] sm:$0xff] }
 0x183   :  { %v198_v24 = vpop.xlane.xlu0 %197 }
 0x184   :  { %v199_v25 = vsub.f32 %v194_v22, %v198_v24  ;;  %v595_v22 = vld [vmem:[#allocation4 + $0x90] sm:$0xff] }
 0x185   :  { %v1232_v24 = vpack.c.bf16 %v596_v23, %v595_v22 }
 0x186   :  { %v200_v26 = vmul.f32 1.442695, %v199_v25  ;;  %v824_v25 = vld [vmem:[#allocation4 + $0x100] sm:$0xff] }
 0x188   :  { %1258 = vpow2.f32 %v200_v26  ;;  %v825_v26 = vld [vmem:[#allocation4 + $0x108] sm:$0xff] }
 0x192   :  { %v1259_v27 = vpop.eup %1258 }
 0x193   :  { %v202_v28 = vsel %vm195_vm4, %v1259_v27, 0.0 }
 0x194   :  { %203 = vadd.xlane.f32.xlu0 %v202_v28  ;;  %v826_v28 = vld [vmem:[#allocation4 + $0x110] sm:$0xff] }
 0x195   :  { %v1244_v30 = vpack.c.bf16 %v827_v29, %v826_v28 }
 0x221   :  { %v204_v36 = vpop.xlane.xlu0 %203 }
 0x222   :  { %1260 = vrcp.f32 %v204_v36  ;;  %v1250_v36 = vpack.c.bf16 %v909_v35, %v908_v33 }
 0x22c   :  { %v1261_v39 = vpop.eup %1260 }
 0x22d   :  { %v206_v41 = vmul.f32 %v1261_v39, %v1259_v27  ;;  %v1241_v27 = vpack.c.bf16 %v825_v26, %v824_v25 }
 0x22f   :  { %1000 = vst.msk [vmem:[%s1439_s4 + $0x2] sm:$0x1] %vm195_vm4, %v206_v41  ;;  %1095 = vmatmul.mubr.msk.f32.vlgmr.msra.gmra.mrb[2].mxu1 %vm208_vm5, %v206_v41 }
 0x230   :  { %1209 = vmatpush3.bf16.msra.mxu1 %v1208_v40  ;;  %1112 = vmatprep.mubr.msk.f32.mxu1 %vm1305_vm0, %v1304_v2 }
 0x231   :  { %1210 = vmatprep.subr.bf16.mxu1 %v1303_v1 }
 0x233   :  { %1113 = vmatmul.mubr.msk.f32.vlgmr.msra.gmra.mrb[4].mxu1 %vm119_vm2, %v1006_v14 }
 0x234   :  { %1123 = vmatprep.mubr.msk.f32.mxu1 %vm1305_vm0, %v1304_v2  ;;  %1212 = vmatpush3.bf16.msra.mxu1 %v1211_v45  ;;  %v741_v45 = vld [vmem:[#allocation4 + $0x143] sm:$0x1] }
 0x235   :  { %1213 = vmatprep.subr.bf16.mxu1 %v1303_v1 }
 0x238   :  { %1215 = vmatpush3.bf16.msra.mxu1 %v1214_v47 }
 0x239   :  { %1222 = vmatprep.subr.bf16.mxu1 %v1303_v1 }
 0x23b   :  { %1124 = vmatmul.mubr.msk.f32.vlgmr.msra.gmra.mrb[6].mxu1 %vm45_vm3, %v1363_v15 }
 0x23c   :  { %1224 = vmatpush3.bf16.msra.mxu1 %v1223_v50  ;;  %1145 = vmatprep.mubr.msk.f32.mxu1 %vm1305_vm0, %v1304_v2 }
 0x23d   :  { %1225 = vmatprep.subr.bf16.mxu1 %v1303_v1 }
 0x240   :  { %1227 = vmatpush3.bf16.msra.mxu1 %v1226_v53  ;;  %v828_v53 = vld [vmem:[#allocation4 + $0x145] sm:$0x1] }
 0x241   :  { %1234 = vmatprep.subr.bf16.mxu1 %v1303_v1 }
 0x243   :  { %1146 = vmatmul.mubr.msk.f32.vlgmr.msra.gmra.mrb[8].mxu1 %vm45_vm3, %v1363_v15 }
 0x244   :  { %1167 = vmatprep.mubr.msk.f32.mxu1 %vm1305_vm0, %v1304_v2  ;;  %1236 = vmatpush3.bf16.msra.mxu1 %v1235_v63 }
 0x245   :  { %1237 = vmatprep.subr.bf16.mxu1 %v1303_v1 }
 0x248   :  { %1239 = vmatpush3.bf16.msra.mxu1 %v1238_v7 }
 0x249   :  { %1246 = vmatprep.subr.bf16.mxu1 %v1303_v1 }
 0x302   :  { %v278_v57 = vpop.f32.mrb[2].mxu1 }
 0x303   :  { %v1096_v58 = vpop.f32.mrb[3].mxu1  ;;  %1106 = vmatmul.mubr.msk.f32.vlgmr.msra.gmra.mrb[2].mxu0 %vm45_vm3, %v278_v57  ;;  %v753_v57 = vld [vmem:[#allocation4 + $0x144] sm:$0x1] }
 0x304   :  { %1218 = vmatpush3.bf16.msra.mxu0 %v1217_v56  ;;  %1134 = vmatprep.mubr.msk.f32.mxu0 %vm1305_vm0, %v1304_v2 }
 0x305   :  { %1219 = vmatprep.subr.bf16.mxu0 %v1303_v1 }
 0x306   :  { %v427_v59 = vpop.f32.mrb[4].mxu1 }
 0x307   :  { %v1114_v60 = vpop.f32.mrb[5].mxu1 }
 0x308   :  { %1221 = vmatpush3.bf16.msra.mxu0 %v1220_v4 }
 0x309   :  { %1228 = vmatprep.subr.bf16.mxu0 %v1303_v1 }
 0x30e   :  { %v508_v8 = vpop.f32.mrb[6].mxu1 }
 0x30f   :  { %v1125_v9 = vpop.f32.mrb[7].mxu1 }
 0x316   :  { %v667_v10 = vpop.f32.mrb[8].mxu1 }
 0x317   :  { %v1147_v11 = vpop.f32.mrb[9].mxu1 }
 0x3d6   :  { %v357_v12 = vpop.f32.mrb[2].mxu0 }
 0x3d7   :  { %v428_v14 = vadd.f32 %v427_v59, %v357_v12  ;;  %v1107_v16 = vpop.f32.mrb[3].mxu0 }
 0x3d9   :  { %v432_v19 = vadd.f32 %v431_v13, %v428_v14 }
 0x3db   :  { %v433_v21 = vmax.f32 %v432_v19, 0.0 }
 0x3dd   :  { %1135 = vmatmul.mubr.msk.f32.vlgmr.msra.gmra.mrb[4].mxu0 %vm45_vm3, %v433_v21  ;;  %1168 = vmatmul.mubr.msk.f32.vlgmr.msra.gmra.mrb[10].mxu1 %vm45_vm3, %v433_v21 }
 0x3de   :  { %1230 = vmatpush3.bf16.msra.mxu0 %v1229_v20  ;;  %1156 = vmatprep.mubr.msk.f32.mxu0 %vm1305_vm0, %v1304_v2 }
 0x3df   :  { %1231 = vmatprep.subr.bf16.mxu0 %v1303_v1  ;;  %1189 = vmatprep.mubr.msk.f32.mxu1 %vm1305_vm0, %v1304_v2 }
 0x3e0   :  { %1248 = vmatpush3.bf16.msra.mxu1 %v1247_v34 }
 0x3e1   :  { %1249 = vmatprep.subr.bf16.mxu1 %v1303_v1 }
 0x3e2   :  { %1233 = vmatpush3.bf16.msra.mxu0 %v1232_v24 }
 0x3e3   :  { %1240 = vmatprep.subr.bf16.mxu0 %v1303_v1 }
 0x3e4   :  { %1251 = vmatpush3.bf16.msra.mxu1 %v1250_v36 }
 0x3e5   :  { %1157 = vmatmul.mubr.msk.f32.vlgmr.msra.gmra.mrb[6].mxu0 %vm45_vm3, %v433_v21 }
 0x3e6   :  { %1242 = vmatpush3.bf16.msra.mxu0 %v1241_v27  ;;  %1178 = vmatprep.mubr.msk.f32.mxu0 %vm1305_vm0, %v1304_v2 }
 0x3e7   :  { %1243 = vmatprep.subr.bf16.mxu0 %v1303_v1 }
 0x3ea   :  { %1245 = vmatpush3.bf16.msra.mxu0 %v1244_v30 }
 0x3ed   :  { %1179 = vmatmul.mubr.msk.f32.vlgmr.msra.gmra.mrb[8].mxu0 %vm45_vm3, %v1363_v15 }
 0x4b0   :  { %v581_v37 = vpop.f32.mrb[4].mxu0  ;;  %v820_v39 = vpop.f32.mrb[10].mxu1 }
 0x4b1   :  { %v582_v2 = vadd.f32 %v581_v37, %v508_v8  ;;  %v1136_v40 = vpop.f32.mrb[5].mxu0  ;;  %v1169_v41 = vpop.f32.mrb[11].mxu1  ;;  %v821_v59 = vadd.f32 %v820_v39, %v753_v57 }
 0x4b3   :  { %v586_v42 = vadd.f32 %v585_v38, %v582_v2 }
 0x4b5   :  { %v1014_v43 = vmul.f32 -1.442695, %v586_v42 }
 0x4b7   :  { %1262 = vpow2.f32 %v1014_v43 }
 0x4b8   :  { %v737_v44 = vpop.f32.mrb[6].mxu0 }
 0x4b9   :  { %v738_v46 = vadd.f32 %v737_v44, %v667_v10  ;;  %v1158_v47 = vpop.f32.mrb[7].mxu0 }
 0x4bb   :  { %v742_v48 = vadd.f32 %v741_v45, %v738_v46 }
 0x4bd   :  { %v1017_v49 = vmul.f32 -1.442695, %v742_v48 }
 0x4bf   :  { %1264 = vpow2.f32 %v1017_v49 }
 0x4c0   :  { %v895_v50 = vpop.f32.mrb[8].mxu0 }
 0x4c1   :  { %v1263_v51 = vpop.eup %1262  ;;  %v1180_v1 = vpop.f32.mrb[9].mxu0  ;;  %v896_v56 = vadd.f32 %v895_v50, %v828_v53 }
 0x4c2   :  { %v590_v52 = vadd.f32 1.0, %v1263_v51 }
 0x4c4   :  { %1266 = vrcp.f32 %v590_v52 }
 0x4c9   :  { %v1265_v54 = vpop.eup %1264 }
 0x4ca   :  { %v746_v55 = vadd.f32 1.0, %v1265_v54 }
 0x4cc   :  { %1268 = vrcp.f32 %v746_v55 }
 0x4ce   :  { %v1267_v58 = vpop.eup %1266 }
 0x4cf   :  { %v899_v60 = vmul.f32 %v1267_v58, %v896_v56 }
 0x4d1   :  { %v900_v61 = vadd.f32 %v899_v60, %v821_v59 }
 0x4d3   :  { %1270 = vtanh.f32 %v900_v61 }
 0x4d6   :  { %v1269_v62 = vpop.eup %1268 }
 0x4d7   :  { %v902_v63 = vsub.f32 1.0, %v1269_v62  ;;  %v904_v4 = vmul.f32 %v1269_v62, %v1363_v15 }
 0x4dd   :  { %v1271_v0 = vpop.eup %1270 }
 0x4de   :  { %v903_v3 = vmul.f32 %v1271_v0, %v902_v63 }
 0x4e0   :  { %v905_v5 = vadd.f32 %v904_v4, %v903_v3 }
 0x4e2   :  { %1190 = vmatmul.mubr.msk.f32.vlgmr.msra.gmra.mrb[12].mxu1 %vm45_vm3, %v905_v5  ;;  %999 = vst.msk [vmem:[%s1439_s4 + $0x1] sm:$0x1] %vm998_vm6, %v905_v5 }
 0x5b5   :  { %v980_v7 = vpop.f32.mrb[12].mxu1 }
 0x5b6   :  { %v981_v8 = vadd.f32 %v980_v7, %v910_v6  ;;  %v1191_v9 = vpop.f32.mrb[13].mxu1 }
 0x5b8   :  { %v985_v10 = vsel %vm984_vm7, %v981_v8, -inf }
 0x5b9   :  { %986 = vmax.xlane.f32.xlu1 %v985_v10 }
 0x646   :  { %v987_v11 = vpop.xlane.xlu1 %986 }
 0x647   :  { %v988_v12 = vsub.f32 %v981_v8, %v987_v11 }
 0x649   :  { %v989_v13 = vmul.f32 1.442695, %v988_v12 }
 0x64b   :  { %1272 = vpow2.f32 %v989_v13 }
 0x655   :  { %v1273_v15 = vpop.eup %1272 }
 0x656   :  { %v991_v14 = vsel %vm984_vm7, %v1273_v15, 0.0 }
 0x657   :  { %992 = vadd.xlane.f32.xlu1 %v991_v14 }
 0x6e4   :  { %v993_v16 = vpop.xlane.xlu1 %992 }
 0x6e5   :  { %1274 = vlog2.f32 %v993_v16 }
 0x6ef   :  { %v1275_v17 = vpop.eup %1274 }
 0x6f0   :  { %v995_v18 = vmul.f32 0.6931472, %v1275_v17 }
 0x6f2   :  { %v996_v19 = vsub.f32 %v988_v12, %v995_v18 }
 0x6f4   :  { %997 = vst.msk [vmem:[%s1439_s4] sm:$0x1] %vm984_vm7, %v996_v19 }
 0x6f5   :  { %1005 = vsyncpa [#allocation5], 1 }

</bundles_post_ra>
